<compile_context>
chip_gen: v5e
topology: v5e:2x2
jax: 0.10.0
libtpu: 0.0.40
codegen_flags: <defaults>
</compile_context>

<pallas_src>
import jax
import jax.numpy as jnp
from jax.experimental import pallas as pl
from jax.experimental.pallas import tpu as pltpu

# ----------------------------- problem sizes ------------------------------
B = 4         # graphs per call
N = 8         # nodes per graph
D_IN = 32     # in_feats
H = 4         # num_heads
F = 16        # out_feats
HF = H * F    # 64
G = 2         # graphs packed per 128-lane slab (== per grid program)
GHF = G * HF  # 128 -> one full lane width
GH = G * H    # 8
NEG_SLOPE = 0.2
NEG_INF = -1e30   # f32-safe additive mask (see TODO about bf16 logits)


# ------------------------------ Pallas kernel -----------------------------
def gatv2_kernel(x_ref, w_ref, b_ref, ablk_ref, hmask_ref,
                 bias_ref, mult_ref, out_ref):
    # x_ref:     (N, G*D_IN)       bf16  packed node feats for a graph pair
    # w_ref:     (G*D_IN, 2*G*HF)  bf16  block-diag fused fc_src|fc_dst weight
    # b_ref:     (1, 2*G*HF)       f32   fused bias
    # ablk_ref:  (G*HF, G*H)       f32   block-diag per-head attention vectors
    # hmask_ref: (G*H, G*HF)       bf16  0/1 head -> lane-slab expansion mask
    # bias_ref:  (N, N, G*H)       f32   [src, dst, g*H+h] additive adj mask
    # mult_ref:  (N, N, G*H)       f32   [src, dst, g*H+h] 0/1 adj mask
    # out_ref:   (N, G*HF)         f32   packed output (lane dense)

    # 1. Fused, pair-packed projection: ONE bf16 MXU matmul, f32 accumulation.
    feat = jnp.dot(x_ref[...], w_ref[...],
                   preferred_element_type=jnp.float32) + b_ref[...]
    feat_src = feat[:, :GHF]                              # (N, 128)
    feat_dst = feat[:, GHF:]                              # (N, 128)

    # 2. e[u, v, :] = leaky_relu(el[u] + er[v]) on full 128-lane vregs.
    e = feat_src[:, None, :] + feat_dst[None, :, :]       # (N, N, 128)
    e = jnp.maximum(e, NEG_SLOPE * e)                     # leaky_relu = one vmax

    # 3. Logits for all heads of both graphs: one MXU contraction against the
    #    block-diagonal (128, G*H) attention matrix.
    score = jnp.dot(e.reshape(N * N, GHF), ablk_ref[...],
                    preferred_element_type=jnp.float32)
    score = score.reshape(N, N, GH)                       # [src, dst, g*H+h]

    # 4. Edge softmax over incoming edges (src axis 0 -> cheap vreg-wise
    #    max/sum); adjacency mask precomputed in the wrapper.
    score = score + bias_ref[...]
    m = jnp.max(score, axis=0, keepdims=True)             # (1, N, G*H)
    p = jnp.exp(score - m) * mult_ref[...]                # zero non-edges
    denom = jnp.maximum(jnp.sum(p, axis=0, keepdims=True), 1e-30)  # 0-in-deg guard
    a = p * pl.reciprocal(denom, approx=False)            # exact reciprocal

    # 5. Aggregation: expand the per-head weights to the full 128-lane width
    #    with ONE bf16 MXU matmul, then a full-width VPU multiply and a
    #    vreg-wise sum over sources; single lane-dense store.
    afull = jnp.dot(a.reshape(N * N, GH).astype(jnp.bfloat16), hmask_ref[...],
                    preferred_element_type=jnp.float32).reshape(N, N, GHF)
    out_ref[...] = jnp.sum(afull * feat_src[:, None, :], axis=0)   # (N, 128)


# --------------------------------- wrapper ---------------------------------
def gatv2_forward(x, w_src, b_src, w_dst, b_dst, attn, adj):
    b, n, d_in = x.shape
    hf = w_src.shape[1]
    h, f = attn.shape
    assert b % G == 0, "batch must be a multiple of 2 graphs (pad upstream)"
    pairs = b // G
    ghf, gh = G * hf, G * h

    # ---- wrapper-side layout plumbing (traced once; pure data movement) ----
    # Pack graph pairs along lanes: x_pack[p, u, g*D_IN + k] = x[G*p + g, u, k].
    x_pack = (x.reshape(pairs, G, n, d_in).transpose(0, 2, 1, 3)
               .reshape(pairs, n, G * d_in).astype(jnp.bfloat16))

    # Block-diagonal fused fc_src|fc_dst weight; output column layout:
    #   [g0 src | g1 src | g0 dst | g1 dst]  (2*G*HF = 256 lanes).
    eye_g = jnp.eye(G, dtype=jnp.float32)
    w_big = jnp.concatenate([jnp.kron(eye_g, w_src),
                             jnp.kron(eye_g, w_dst)], axis=1).astype(jnp.bfloat16)
    b_big = jnp.concatenate([jnp.tile(b_src, (1, G)),
                             jnp.tile(b_dst, (1, G))], axis=1)       # (1, 2*G*HF)

    # Block-diagonal attention matrix: ablk[g*HF + hh*F + ff, g*H + hh] = attn[hh, ff].
    a_blk1 = (attn[:, :, None] * jnp.eye(h, dtype=jnp.float32)[:, None, :]).reshape(hf, h)
    a_blk = jnp.kron(eye_g, a_blk1)                                  # (G*HF, G*H)

    # Head -> lane-slab mask: hmask[g*H + hh, g*HF + hh*F : g*HF + (hh+1)*F] = 1.
    hmask1 = jnp.kron(jnp.eye(h, dtype=jnp.float32), jnp.ones((1, f), jnp.float32))
    hmask = jnp.kron(eye_g, hmask1).astype(jnp.bfloat16)             # (G*H, G*HF)

    # Adjacency in [pair, src, dst, g*H + head] layout; additive bias + 0/1 mult.
    adj_p = adj.reshape(pairs, G, n, n)                   # [p, g, u, v]
    adj_uv = jnp.transpose(adj_p, (0, 2, 3, 1))           # [p, u, v, g]
    adj_gh = jnp.repeat(adj_uv, h, axis=-1)               # [p, u, v, g*H + h]
    adj_mult = (adj_gh > 0).astype(jnp.float32)
    adj_bias = jnp.where(adj_gh > 0, 0.0, NEG_INF).astype(jnp.float32)

    out_packed = pl.pallas_call(
        gatv2_kernel,
        out_shape=jax.ShapeDtypeStruct((pairs, n, ghf), jnp.float32),
        grid_spec=pltpu.PrefetchScalarGridSpec(
            num_scalar_prefetch=0,
            grid=(pairs,),
            in_specs=[
                pl.BlockSpec((None, n, G * d_in), lambda i: (i, 0, 0)),   # x_pack
                pl.BlockSpec((G * d_in, 2 * ghf), lambda i: (0, 0)),      # w_big
                pl.BlockSpec((1, 2 * ghf), lambda i: (0, 0)),             # b_big
                pl.BlockSpec((ghf, gh), lambda i: (0, 0)),                # a_blk
                pl.BlockSpec((gh, ghf), lambda i: (0, 0)),                # hmask
                pl.BlockSpec((None, n, n, gh), lambda i: (i, 0, 0, 0)),   # adj_bias
                pl.BlockSpec((None, n, n, gh), lambda i: (i, 0, 0, 0)),   # adj_mult
            ],
            out_specs=pl.BlockSpec((None, n, ghf), lambda i: (i, 0, 0)),  # lane dense
        ),
        compiler_params=pltpu.CompilerParams(
            dimension_semantics=("parallel",)),   # one program per TC on v7x
    )(x_pack, w_big, b_big, a_blk, hmask, adj_bias, adj_mult)

    # Unpack graph pairs: out[G*p + g, v, :] = out_packed[p, v, g*HF:(g+1)*HF].
    return (out_packed.reshape(pairs, n, G, hf).transpose(0, 2, 1, 3)
                      .reshape(b, n, hf))


# --------------------------- pure-JAX reference ----------------------------
def gatv2_reference(x, w_src, b_src, w_dst, b_dst, attn, adj):
    b, n, _ = x.shape
    h, f = attn.shape
    fs = (x @ w_src + b_src).reshape(b, n, h, f)
    fd = (x @ w_dst + b_dst).reshape(b, n, h, f)
    e = fs[:, :, None, :, :] + fd[:, None, :, :, :]              # (B,Ns,Nd,H,F)
    e = jnp.where(e >= 0, e, NEG_SLOPE * e)
    score = jnp.sum(e * attn[None, None, None, :, :], axis=-1)   # (B,Ns,Nd,H)
    mask = adj[:, :, :, None] > 0
    score = jnp.where(mask, score, NEG_INF)
    m = jnp.max(score, axis=1, keepdims=True)
    p = jnp.exp(score - m) * adj[:, :, :, None]
    a_w = p / jnp.maximum(jnp.sum(p, axis=1, keepdims=True), 1e-30)
    out = jnp.einsum('buvh,buhf->bvhf', a_w, fs)
    return out.reshape(b, n, h * f)


# --------------------------- parameter init --------------------------------
def xavier_normal(key, shape, fan_in, fan_out, gain):
    std = gain * jnp.sqrt(2.0 / (fan_in + fan_out))
    return std * jax.random.normal(key, shape, dtype=jnp.float32)


if __name__ == "__main__":
    key = jax.random.PRNGKey(0)
    k_x, k_ws, k_wd, k_a, k_adj = jax.random.split(key, 5)

    gain = float(jnp.sqrt(2.0))  # nn.init.calculate_gain('relu')

    # fc weights stored as (D_IN, H*F); xavier fans match PyTorch (H*F, D_IN).
    w_src = xavier_normal(k_ws, (D_IN, HF), fan_in=D_IN, fan_out=HF, gain=gain)
    w_dst = xavier_normal(k_wd, (D_IN, HF), fan_in=D_IN, fan_out=HF, gain=gain)
    b_src = jnp.zeros((1, HF), jnp.float32)   # bias init: constant 0
    b_dst = jnp.zeros((1, HF), jnp.float32)
    # attn param: PyTorch shape (1, H, F) -> fan_in = H*F, fan_out = F.
    attn = xavier_normal(k_a, (H, F), fan_in=HF, fan_out=F, gain=gain)

    # Batched node features + random directed graphs with self-loops
    # (guarantees no 0-in-degree nodes, matching the DGL error path).
    x = jax.random.normal(k_x, (B, N, D_IN), dtype=jnp.float32)
    adj = (jax.random.uniform(k_adj, (B, N, N)) < 0.4).astype(jnp.float32)
    adj = jnp.maximum(adj, jnp.eye(N, dtype=jnp.float32)[None])

    out = gatv2_forward(x, w_src, b_src, w_dst, b_dst, attn, adj)
    out = jax.block_until_ready(out)

    ref = gatv2_reference(x, w_src, b_src, w_dst, b_dst, attn, adj)
    assert out.shape == (B, N, HF)
    # Tolerance covers the bf16 MXU operands (f32 accumulation; softmax and all
    # elementwise math are exact f32, approx reciprocal removed per review).
    assert jnp.allclose(out, ref, atol=2e-2, rtol=2e-2), "mismatch vs reference"

    print("KERNEL_OK")
</pallas_src>

<mosaic_0001>
module attributes {stable_mosaic.version = 11 : i64} {
  func.func @gatv2_kernel(%arg0: i32, %arg1: memref<1x8x64xbf16, #tpu.memory_space<vmem>>, %arg2: memref<64x256xbf16, #tpu.memory_space<vmem>>, %arg3: memref<1x256xf32, #tpu.memory_space<vmem>>, %arg4: memref<128x8xf32, #tpu.memory_space<vmem>>, %arg5: memref<8x128xbf16, #tpu.memory_space<vmem>>, %arg6: memref<1x8x8x8xf32, #tpu.memory_space<vmem>>, %arg7: memref<1x8x8x8xf32, #tpu.memory_space<vmem>>, %arg8: memref<1x8x128xf32, #tpu.memory_space<vmem>>) attributes {dimension_semantics = [#tpu.dimension_semantics<parallel>], iteration_bounds = array<i64: 2>, scalar_prefetch = 0 : i64, scratch_operands = 0 : i64, tpu.core_type = #tpu.core_type<tc>, window_params = [{transform_indices = @transform_0, window_bounds = array<i64: 1, 8, 64>}, {pipeline_mode = #tpu.pipeline_mode<synchronous>, transform_indices = @transform_1, window_bounds = array<i64: 64, 256>}, {pipeline_mode = #tpu.pipeline_mode<synchronous>, transform_indices = @transform_2, window_bounds = array<i64: 1, 256>}, {pipeline_mode = #tpu.pipeline_mode<synchronous>, transform_indices = @transform_3, window_bounds = array<i64: 128, 8>}, {pipeline_mode = #tpu.pipeline_mode<synchronous>, transform_indices = @transform_4, window_bounds = array<i64: 8, 128>}, {transform_indices = @transform_5, window_bounds = array<i64: 1, 8, 8, 8>}, {transform_indices = @transform_6, window_bounds = array<i64: 1, 8, 8, 8>}, {transform_indices = @transform_7, window_bounds = array<i64: 1, 8, 128>}]} {
    %c0 = arith.constant 0 : index
    %c0_0 = arith.constant 0 : index
    %c0_1 = arith.constant 0 : index
    %0 = vector.load %arg1[%c0, %c0_0, %c0_1] : memref<1x8x64xbf16, #tpu.memory_space<vmem>>, vector<1x8x64xbf16>
    %1 = vector.shape_cast %0 : vector<1x8x64xbf16> to vector<8x64xbf16>
    %c0_2 = arith.constant 0 : index
    %c0_3 = arith.constant 0 : index
    %2 = vector.load %arg2[%c0_2, %c0_3] : memref<64x256xbf16, #tpu.memory_space<vmem>>, vector<64x256xbf16>
    %cst = arith.constant dense<0.000000e+00> : vector<8x256xf32>
    %3 = tpu.matmul %1, %2, %cst {dimension_numbers = #tpu.dot_dimension_numbers<[1], [0], [0], [1], [0, 0, 1, 1], [], []>} : vector<8x64xbf16>, vector<64x256xbf16>, vector<8x256xf32> -> vector<8x256xf32>
    %c0_4 = arith.constant 0 : index
    %c0_5 = arith.constant 0 : index
    %4 = vector.load %arg3[%c0_4, %c0_5] : memref<1x256xf32, #tpu.memory_space<vmem>>, vector<1x256xf32>
    %5 = vector.broadcast %4 : vector<1x256xf32> to vector<8x256xf32>
    %6 = arith.addf %3, %5 : vector<8x256xf32>
    %7 = vector.extract_strided_slice %6 {offsets = [0, 0], sizes = [8, 128], strides = [1, 1]} : vector<8x256xf32> to vector<8x128xf32>
    %8 = vector.extract_strided_slice %6 {offsets = [0, 128], sizes = [8, 128], strides = [1, 1]} : vector<8x256xf32> to vector<8x128xf32>
    %9 = vector.shape_cast %7 : vector<8x128xf32> to vector<8x1x128xf32>
    %10 = vector.shape_cast %8 : vector<8x128xf32> to vector<1x8x128xf32>
    %11 = vector.broadcast %9 : vector<8x1x128xf32> to vector<8x8x128xf32>
    %12 = vector.broadcast %10 : vector<1x8x128xf32> to vector<8x8x128xf32>
    %13 = arith.addf %11, %12 : vector<8x8x128xf32>
    %cst_6 = arith.constant 2.000000e-01 : f32
    %14 = vector.broadcast %cst_6 : f32 to vector<8x8x128xf32>
    %15 = arith.mulf %14, %13 : vector<8x8x128xf32>
    %16 = arith.maximumf %13, %15 : vector<8x8x128xf32>
    %17 = vector.shape_cast %16 : vector<8x8x128xf32> to vector<64x128xf32>
    %c0_7 = arith.constant 0 : index
    %c0_8 = arith.constant 0 : index
    %18 = vector.load %arg4[%c0_7, %c0_8] : memref<128x8xf32, #tpu.memory_space<vmem>>, vector<128x8xf32>
    %cst_9 = arith.constant dense<0.000000e+00> : vector<64x8xf32>
    %19 = tpu.matmul %17, %18, %cst_9 {dimension_numbers = #tpu.dot_dimension_numbers<[1], [0], [0], [1], [0, 0, 1, 1], [], []>} : vector<64x128xf32>, vector<128x8xf32>, vector<64x8xf32> -> vector<64x8xf32>
    %20 = vector.shape_cast %19 : vector<64x8xf32> to vector<8x8x8xf32>
    %c0_10 = arith.constant 0 : index
    %c0_11 = arith.constant 0 : index
    %c0_12 = arith.constant 0 : index
    %c0_13 = arith.constant 0 : index
    %21 = vector.load %arg6[%c0_10, %c0_11, %c0_12, %c0_13] : memref<1x8x8x8xf32, #tpu.memory_space<vmem>>, vector<1x8x8x8xf32>
    %22 = vector.shape_cast %21 : vector<1x8x8x8xf32> to vector<8x8x8xf32>
    %23 = arith.addf %20, %22 : vector<8x8x8xf32>
    %cst_14 = arith.constant dense<0xFF800000> : vector<8x8xf32>
    %24 = vector.multi_reduction <maximumf>, %23, %cst_14 [0] : vector<8x8x8xf32> to vector<8x8xf32>
    %25 = vector.shape_cast %24 : vector<8x8xf32> to vector<1x8x8xf32>
    %26 = vector.broadcast %25 : vector<1x8x8xf32> to vector<8x8x8xf32>
    %27 = arith.subf %23, %26 : vector<8x8x8xf32>
    %28 = math.exp %27 : vector<8x8x8xf32>
    %c0_15 = arith.constant 0 : index
    %c0_16 = arith.constant 0 : index
    %c0_17 = arith.constant 0 : index
    %c0_18 = arith.constant 0 : index
    %29 = vector.load %arg7[%c0_15, %c0_16, %c0_17, %c0_18] : memref<1x8x8x8xf32, #tpu.memory_space<vmem>>, vector<1x8x8x8xf32>
    %30 = vector.shape_cast %29 : vector<1x8x8x8xf32> to vector<8x8x8xf32>
    %31 = arith.mulf %28, %30 : vector<8x8x8xf32>
    %cst_19 = arith.constant dense<0.000000e+00> : vector<8x8xf32>
    %32 = vector.multi_reduction <add>, %31, %cst_19 [0] : vector<8x8x8xf32> to vector<8x8xf32>
    %33 = vector.shape_cast %32 : vector<8x8xf32> to vector<1x8x8xf32>
    %cst_20 = arith.constant 1.000000e-30 : f32
    %34 = vector.broadcast %cst_20 : f32 to vector<1x8x8xf32>
    %35 = arith.maximumf %33, %34 : vector<1x8x8xf32>
    %36 = tpu.reciprocal %35 : vector<1x8x8xf32> -> vector<1x8x8xf32>
    %37 = vector.broadcast %36 : vector<1x8x8xf32> to vector<8x8x8xf32>
    %38 = arith.mulf %31, %37 : vector<8x8x8xf32>
    %39 = vector.shape_cast %38 : vector<8x8x8xf32> to vector<64x8xf32>
    %40 = arith.truncf %39 : vector<64x8xf32> to vector<64x8xbf16>
    %c0_21 = arith.constant 0 : index
    %c0_22 = arith.constant 0 : index
    %41 = vector.load %arg5[%c0_21, %c0_22] : memref<8x128xbf16, #tpu.memory_space<vmem>>, vector<8x128xbf16>
    %cst_23 = arith.constant dense<0.000000e+00> : vector<64x128xf32>
    %42 = tpu.matmul %40, %41, %cst_23 {dimension_numbers = #tpu.dot_dimension_numbers<[1], [0], [0], [1], [0, 0, 1, 1], [], []>} : vector<64x8xbf16>, vector<8x128xbf16>, vector<64x128xf32> -> vector<64x128xf32>
    %43 = vector.shape_cast %42 : vector<64x128xf32> to vector<8x8x128xf32>
    %44 = vector.shape_cast %7 : vector<8x128xf32> to vector<8x1x128xf32>
    %45 = vector.broadcast %44 : vector<8x1x128xf32> to vector<8x8x128xf32>
    %46 = arith.mulf %43, %45 : vector<8x8x128xf32>
    %cst_24 = arith.constant dense<0.000000e+00> : vector<8x128xf32>
    %47 = vector.multi_reduction <add>, %46, %cst_24 [0] : vector<8x8x128xf32> to vector<8x128xf32>
    %c0_25 = arith.constant 0 : index
    %c0_26 = arith.constant 0 : index
    %c0_27 = arith.constant 0 : index
    %48 = vector.load %arg8[%c0_25, %c0_26, %c0_27] : memref<1x8x128xf32, #tpu.memory_space<vmem>>, vector<1x8x128xf32>
    %49 = vector.shape_cast %48 : vector<1x8x128xf32> to vector<8x128xf32>
    %50 = vector.shape_cast %47 : vector<8x128xf32> to vector<1x8x128xf32>
    tpu.vector_store %arg8[%c0_25, %c0_26, %c0_27], %50 {strides = array<i32>} : memref<1x8x128xf32, #tpu.memory_space<vmem>>, vector<1x8x128xf32>,
    return
  }
  func.func @transform_0(%arg0: i32) -> (i32, i32, i32) {
    %c0_i32 = arith.constant 0 : i32
    %c0_i32_0 = arith.constant 0 : i32
    %c0_i32_1 = arith.constant 0 : i32
    return %arg0, %c0_i32, %c0_i32_0 : i32, i32, i32
  }
  func.func @transform_1(%arg0: i32) -> (i32, i32) {
    %c0_i32 = arith.constant 0 : i32
    %c0_i32_0 = arith.constant 0 : i32
    %c0_i32_1 = arith.constant 0 : i32
    return %c0_i32, %c0_i32_0 : i32, i32
  }
  func.func @transform_2(%arg0: i32) -> (i32, i32) {
    %c0_i32 = arith.constant 0 : i32
    %c0_i32_0 = arith.constant 0 : i32
    %c0_i32_1 = arith.constant 0 : i32
    return %c0_i32, %c0_i32_0 : i32, i32
  }
  func.func @transform_3(%arg0: i32) -> (i32, i32) {
    %c0_i32 = arith.constant 0 : i32
    %c0_i32_0 = arith.constant 0 : i32
    %c0_i32_1 = arith.constant 0 : i32
    return %c0_i32, %c0_i32_0 : i32, i32
  }
  func.func @transform_4(%arg0: i32) -> (i32, i32) {
    %c0_i32 = arith.constant 0 : i32
    %c0_i32_0 = arith.constant 0 : i32
    %c0_i32_1 = arith.constant 0 : i32
    return %c0_i32, %c0_i32_0 : i32, i32
  }
  func.func @transform_5(%arg0: i32) -> (i32, i32, i32, i32) {
    %c0_i32 = arith.constant 0 : i32
    %c0_i32_0 = arith.constant 0 : i32
    %c0_i32_1 = arith.constant 0 : i32
    %c0_i32_2 = arith.constant 0 : i32
    return %arg0, %c0_i32, %c0_i32_0, %c0_i32_1 : i32, i32, i32, i32
  }
  func.func @transform_6(%arg0: i32) -> (i32, i32, i32, i32) {
    %c0_i32 = arith.constant 0 : i32
    %c0_i32_0 = arith.constant 0 : i32
    %c0_i32_1 = arith.constant 0 : i32
    %c0_i32_2 = arith.constant 0 : i32
    return %arg0, %c0_i32, %c0_i32_0, %c0_i32_1 : i32, i32, i32, i32
  }
  func.func @transform_7(%arg0: i32) -> (i32, i32, i32) {
    %c0_i32 = arith.constant 0 : i32
    %c0_i32_0 = arith.constant 0 : i32
    %c0_i32_1 = arith.constant 0 : i32
    return %arg0, %c0_i32, %c0_i32_0 : i32, i32, i32
  }
}

</mosaic_0001>

<bundles_post_ra>
// kernel: tpu_custom_call.1
= control target key start
LH: loop header
LB: loop body
LE: loop exit
PB: predicated region body
PF: predicated region fallthrough
CT: control target
= control target key end

     0   :  { %s1530_s0 = inlined_call_operand.vmem [shape: bf16[2,8,64], index: 0, kind: input, shape index: {}]   ;;  %s1531_s1 = inlined_call_operand.hbm [shape: bf16[64,256], index: 1, kind: input, shape index: {}]   ;;  %s1532_s2 = inlined_call_operand.hbm [shape: f32[1,256], index: 2, kind: input, shape index: {}]   ;;  %s1533_s3 = inlined_call_operand.vmem [shape: f32[128,8], index: 3, kind: input, shape index: {}]   ;;  %s1534_s4 = inlined_call_operand.vmem [shape: bf16[8,128], index: 4, kind: input, shape index: {}]   ;;  %s1535_s5 = inlined_call_operand.vmem [shape: f32[2,8,8,8], index: 5, kind: input, shape index: {}]   ;;  %s1536_s6 = inlined_call_operand.hbm [shape: f32[2,8,8,8], index: 6, kind: input, shape index: {}]   ;;  %s1537_s7 = inlined_call_operand.hbm [shape: f32[2,8,128], index: 7, kind: output, shape index: {}]  }
   0x1   :  { %1540 = sst [smem:[#allocation13_spill]] %s1531_s1 }
   0x2   :  { %1541 = sst [smem:[#allocation14_spill]] %s1532_s2 }
   0x3   :  { %12 = vsyncpa [#allocation3], 0 }
   0x4   :  { %13 = vsyncpa [#allocation6], 0 }
   0x5   :  { %14 = vsyncpa [#allocation4], 0 }
   0x6   :  { %16 = vsyncpa [#allocation4 + $0x1], 0  ;;  %s1242_s24 = smov 0   ;;  %s1244_s25 = smov 0  }
   0x7   :  { %s1246_s26 = smov 0   ;;  %s1248_s27 = smov 0  }
   0x8 LB: > { %s1263_s28 = sadd.s32 4294967295, %s1196_s27   ;;  %s861_s29 = sadd.s32 4294967294, %s1196_s27   ;;  %s1196_s27 = sphi %s1248_s27, %s1555_s27   ;;  %s1192_s26 = sphi %s1246_s26, %s1554_s26   ;;  %s1188_s25 = sphi %s1244_s25, %s1553_s25   ;;  %s1184_s24 = sphi %s1242_s24, %s1552_s24  }
   0x9   : > { %p178_p0 = scmp.ne.s32.totalorder %s1188_s25, %s1184_s24  ;;  %p179_p1 = scmp.eq.s32.totalorder %s1263_s28, 0 }
   0xa   : > { %p202_p2 = scmp.eq.s32.totalorder %s1263_s28, 1  ;;  %p208_p3 = scmp.eq.s32.totalorder %s861_s29, 1 }
   0xb   : > { %p1272_p4 = por %p179_p1, %p178_p0  ;;  %p862_p5 = scmp.ge.s32.totalorder %s1196_s27, 1 }
   0xc   : > { %p1277_p6 = por %p208_p3, %p178_p0  ;;  %p215_p7 = scmp.lt.s32.totalorder %s1196_s27, 3 }
   0xd   : > { %s1544_s1 = sld [smem:[#allocation13_spill]]  ;;  %s1198_s13 = smov [#allocation2]  }
   0xe   : > { %p1285_p8 = pnand %p862_p5, %p215_p7  ;;  %s228_s14 = sshll.u32 %s1198_s13, 4  ;;  %s229_s14 = int_to_ptr.vmem [resolvable:$true] %s228_s14 }
   0xf   : > { %s1546_s2 = sld [smem:[#allocation14_spill]]  ;;  %s1538_s18 = smov 128  }
  0x10   : > { %p957_p9 = pneg %p1285_p8  ;;  %s1539_s19 = smov 8  }
  0x11   : > { %s1201_s20 = smov [#allocation5]   ;;  %s1301_s22 = sadd.s32 1, %s1196_s27  }
  0x12   : > { %p958_p10 = pnand %p957_p9, %p179_p1  ;;  %s243_s21 = sshll.u32 %s1201_s20, 4  ;;  %s244_s21 = int_to_ptr.vmem [resolvable:$true] %s243_s21 }
  0x13   : > { %s226_s11 = sshll.u32 %s1544_s1, 4  ;;  %s165_s23 = sadd.s32 1, %s1192_s26  ;;  %s227_s11 = int_to_ptr.hbm [resolvable:$true] %s226_s11 }
  0x14   : > { %960 = dma.hbm_to_vmem [thread:$0]  (!%p958_p10), %s227_s11, 1024, %s229_s14, [#allocation3], %s1538_s18, %s1538_s18, %s1539_s19  }
  0x15   : > { %s241_s17 = sshll.u32 %s1546_s2, 4  ;;  %s162_s29 = ssub.s32 %s1196_s27, %s1301_s22  ;;  %s242_s17 = int_to_ptr.hbm [resolvable:$true] %s241_s17 }
  0x16   : > { %963 = dma.hbm_to_vmem [thread:$0]  (!%p958_p10), %s242_s17, 32, %s244_s21, [#allocation6]  }
  0x17   : > { %p172_p12 = scmp.ne.s32.totalorder %s1192_s26, %s1188_s25  ;;  %p163_p13 = scmp.eq.s32.totalorder %s162_s29, 0 }
  0x18   : > { %p173_p0 = scmp.eq.s32.totalorder %s1196_s27, 0  ;;  %p974_p7 = scmp.lt.s32.totalorder %s1196_s27, 2 }
  0x19   : > { %p1311_p3 = por %p202_p2, %p172_p12  ;;  %s275_s11 = sand.u32 1, %s1196_s27  }
  0x1a   : > { %s1316_s10 = scalar_select %p163_p13, %s1192_s26, %s165_s23  }
  0x1b   : > { %p174_p5 = por %p173_p0, %p172_p12  ;;  %s277_s13 = sand.u32 1, %s1192_s26  }
  0x1c   : > { %s866_s14 = sshll.u32 %s277_s13, 6  ;;  %s919_s15 = sshll.u32 %s1196_s27, 6 }
  0x1d   : > { %s284_s20 = scalar_lea.hbm %s1536_s6, %s919_s15  ;;  %s279_s29 = scalar_lea.vmem [#allocation7], %s866_s14 }
  0x1e   : > { %s285_s21 = sshll.u32 %s284_s20, 4  ;;  %s287_s18 = sshll.u32 %s279_s29, 4  ;;  %s286_s21 = int_to_ptr.hbm [resolvable:$true] %s285_s21  ;;  %s288_s18 = int_to_ptr.vmem [resolvable:$true] %s287_s18 }
  0x1f   : > { %p1325_p2 = pnand %p974_p7, %p174_p5  ;;  %s276_s23 = scalar_lea.sflag [#allocation3], %s275_s11 }
  0x20   : > { %s1092_s1 = sshra.s32 %s286_s21, 4  ;;  %s1099_s14 = scalar_lea.hbm %s1536_s6, 128  ;;  %s1093_s1 = int_to_ptr.hbm [resolvable:$true] %s1092_s1 }
  0x21   : > { %s1094_s2 = scalar_lea.hbm %s1093_s1, 64  ;;  %p1096_p10 = pneg %p1325_p2 }
  0x22   : > { %p1095_p9 = scmp.ne.s32.totalorder %s1093_s1, %s1094_s2  ;;  %p1100_p0 = scmp.lt.s32.totalorder %s1093_s1, %s1536_s6 }
  0x23   : > { %p1101_p5 = scmp.lt.s32.totalorder %s1099_s14, %s1094_s2 }
  0x24   : > { %p1097_p12 = pnand %p1096_p10, %p1095_p9 }
  0x25   : > { %p1102_p7 = por %p1101_p5, %p1100_p0 }
  0x26   : > { %p1098_p13 = pneg %p1097_p12 }
  0x28   : > { %p1103_p11 = pnand %p1102_p7, %p1098_p13 }
  0x2a   : > { %1106 = shalt.err (!%p1103_p11)
}
  0x2b   : > { %s1549_s11 = smov 8   ;;  %s1550_s20 = smov 128  }
  0x2c   : > { %967 = dma.hbm_to_vmem [thread:$0]  (!%p1325_p2), %s286_s21, 1024, %s288_s18, %s276_s23, %s1550_s20, %s1550_s20, %s1549_s11  }
  0x2d   : > { %299 = sbr.rel (%p1285_p8) target bundleno = 637 (0x27d), region = 48 }
  0x32   : > { %1167 = dma.done.wait (%p179_p1), [#allocation3], 1024  }
  0x33   : > { %1169 = vsyncadd (%p179_p1), [#allocation3], 4294966272 }
  0x34   : > { %1171 = dma.done.wait (%p179_p1), [#allocation6], 32  }
  0x35   : > { %1173 = vsyncadd (%p179_p1), [#allocation6], 4294967264  ;;  %s311_s1 = sand.u32 1, %s1263_s28   ;;  %s1354_s2 = sand.u32 1, %s1188_s25  }
  0x36   : > { %s872_s12 = sshll.u32 %s1354_s2, 6  ;;  %s312_s18 = scalar_lea.sflag [#allocation3], %s311_s1 }
  0x37   : > { %s1357_s19 = scalar_lea.vmem [#allocation7], %s872_s12 }
  0x38   : > { %1175 = dma.done.wait (%p1272_p4), %s312_s18, 1024  }
  0x39   : > { %1177 = vsyncadd (%p1272_p4), %s312_s18, 4294966272  ;;  %v903_v0 = vld [vmem:[#allocation2 + $0x30] sm:$0xf]  ;;  %v928_v1 = vld [vmem:[#allocation2 + $0x34] sm:$0xf0]  ;;  %p356_p1 = scmp.lt.s32.totalorder %s1263_s28, 1 }
  0x3a   : > { %v895_v2 = vld [vmem:[#allocation2 + $0x20] sm:$0xf]  ;;  %v904_v3 = vor.u32 %v928_v1, %v903_v0  ;;  %v926_v4 = vld [vmem:[#allocation2 + $0x24] sm:$0xf0]  ;;  %v887_v6 = vld [vmem:[#allocation2 + $0x10] sm:$0xf] }
  0x3b   : > { %v896_v5 = vor.u32 %v926_v4, %v895_v2  ;;  %v924_v7 = vld [vmem:[#allocation2 + $0x14] sm:$0xf0]  ;;  %s1365_s21 = scalar_select %p356_p1, %s1263_s28, 1  ;;  %v513_v9 = vld [vmem:[%s1533_s3 + $0x70] sm:$0xff]  ;;  %v512_v11 = vld [vmem:[%s1533_s3 + $0x68] sm:$0xff]  ;;  %vm421_vm0 = vcmask 523264  }
  0x3c   : > { %429 = vmatpush.bf16.msra.mxu1 %v904_v3  ;;  %v514_v8 = vld [vmem:[%s1533_s3 + $0x78] sm:$0xff]  ;;  %v888_v10 = vor.u32 %v924_v7, %v887_v6  ;;  %v879_v12 = vld [vmem:[#allocation2] sm:$0xf]  ;;  %v922_v13 = vld [vmem:[#allocation2 + $0x4] sm:$0xf0]  ;;  %vm683_vm1 = vcmask 1043456  }
  0x3d   : > { %515 = vmatpush.msra.mxu0 %v514_v8  ;;  %929 = vmatpush.msra.mxu2 %v514_v8  ;;  %s874_s16 = sshll.u32 %s1365_s21, 2  ;;  %v927_v14 = vld [vmem:[#allocation2 + $0x34] sm:$0xf]  ;;  %v905_v15 = vld [vmem:[#allocation2 + $0x38] sm:$0xf0]  ;;  %v880_v16 = vor.u32 %v922_v13, %v879_v12  ;;  %v511_v28 = vld [vmem:[%s1533_s3 + $0x60] sm:$0xff] }
  0x3e   : > { %s359_s20 = scalar_lea.vmem %s1530_s0, %s874_s16  ;;  %v908_v17 = vor.u32 %v927_v14, %v905_v15  ;;  %v925_v18 = vld [vmem:[#allocation2 + $0x24] sm:$0xf]  ;;  %v897_v19 = vld [vmem:[#allocation2 + $0x28] sm:$0xf0]  ;;  %v923_v22 = vld [vmem:[#allocation2 + $0x14] sm:$0xf] }
  0x3f   : > { %516 = vmatpush.msra.mxu0 %v513_v9  ;;  %930 = vmatpush.msra.mxu2 %v513_v9  ;;  %v366_v20 = vld [vmem:[%s359_s20] sm:$0xf]  ;;  %v900_v21 = vor.u32 %v925_v18, %v897_v19  ;;  %v889_v23 = vld [vmem:[#allocation2 + $0x18] sm:$0xf0]  ;;  %v921_v25 = vld [vmem:[#allocation2 + $0x4] sm:$0xf] }
  0x40   : > { %430 = vmatpush.bf16.msra.mxu1 %v896_v5  ;;  %v892_v24 = vor.u32 %v923_v22, %v889_v23  ;;  %v881_v26 = vld [vmem:[#allocation2 + $0x8] sm:$0xf0]  ;;  %v510_v29 = vld [vmem:[%s1533_s3 + $0x58] sm:$0xff]  ;;  %v509_v30 = vld [vmem:[%s1533_s3 + $0x50] sm:$0xff]  ;;  %s920_s1 = sshll.u32 %s1365_s21, 6  ;;  %vm572_vm2 = vcmask 64512  }
  0x41   : > { %517 = vmatpush.msra.mxu0 %v512_v11  ;;  %931 = vmatpush.msra.mxu2 %v512_v11  ;;  %v884_v27 = vor.u32 %v921_v25, %v881_v26  ;;  %v508_v31 = vld [vmem:[%s1533_s3 + $0x48] sm:$0xff]  ;;  %v507_v32 = vld [vmem:[%s1533_s3 + $0x40] sm:$0xff]  ;;  %v506_v33 = vld [vmem:[%s1533_s3 + $0x38] sm:$0xff]  ;;  %s364_s29 = scalar_lea.vmem %s1535_s5, %s920_s1  ;;  %s916_s21 = sshll.u32 %s1263_s28, 3 }
  0x42   : > { %v505_v34 = vld [vmem:[%s1533_s3 + $0x30] sm:$0xff]  ;;  %v504_v35 = vld [vmem:[%s1533_s3 + $0x28] sm:$0xff]  ;;  %v503_v36 = vld [vmem:[%s1533_s3 + $0x20] sm:$0xff]  ;;  %s743_s14 = scalar_lea.hbm %s1537_s7, %s916_s21  ;;  %s733_s28 = scalar_lea.sflag [#allocation4], %s1354_s2 }
  0x43   : > { %518 = vmatpush.msra.mxu0 %v511_v28  ;;  %932 = vmatpush.msra.mxu2 %v511_v28  ;;  %v502_v37 = vld [vmem:[%s1533_s3 + $0x18] sm:$0xff]  ;;  %v501_v38 = vld [vmem:[%s1533_s3 + $0x10] sm:$0xff]  ;;  %v500_v39 = vld [vmem:[%s1533_s3 + $0x8] sm:$0xff]  ;;  %s747_s11 = sshll.u32 %s743_s14, 4  ;;  %s748_s11 = int_to_ptr.hbm [resolvable:$true] %s747_s11 }
  0x44   : > { %431 = vmatpush.bf16.msra.mxu1 %v888_v10  ;;  %v499_v40 = vld [vmem:[%s1533_s3] sm:$0xff]  ;;  %s1136_s20 = sshra.s32 %s748_s11, 4  ;;  %s1137_s20 = int_to_ptr.hbm [resolvable:$true] %s1136_s20 }
  0x45   : > { %519 = vmatpush.msra.mxu0 %v510_v29  ;;  %933 = vmatpush.msra.mxu2 %v510_v29  ;;  %v375_v42 = vld [vmem:[#allocation5] sm:$0x3]  ;;  %s1138_s1 = scalar_lea.hbm %s1137_s20, 8  ;;  %p1143_p2 = scmp.lt.s32.totalorder %s1137_s20, %s1537_s7 }
  0x46   : > { %v377_v43 = vperm.slane %v375_v42, 0  ;;  %v378_v46 = vperm.slane %v375_v42, 1  ;;  %p1139_p4 = scmp.ne.s32.totalorder %s1137_s20, %s1138_s1 }
  0x47   : > { %520 = vmatpush.msra.mxu0 %v509_v30  ;;  %934 = vmatpush.msra.mxu2 %v509_v30  ;;  %v670_v30 = vld [vmem:[%s1534_s4] sm:$0xf] }
  0x48   : > { %432 = vmatpush.bf16.msra.mxu1 %v880_v16  ;;  %p1140_p8 = pnand %p1139_p4, %p1311_p3 }
  0x49   : > { %521 = vmatpush.msra.mxu0 %v508_v31  ;;  %935 = vmatpush.msra.mxu2 %v508_v31  ;;  %v561_v31 = vld [vmem:[%s364_s29 + $0x28] sm:$0xff] }
  0x4a   : > { %p1141_p11 = pneg %p1140_p8 }
  0x4b   : > { %909 = vmatmul.msk.bf16.vlgmr.msra.gmra.mxu1 %vm421_vm0, %v366_v20  ;;  %522 = vmatpush.msra.mxu0 %v507_v32 }
  0x4c   : > { %442 = vmatpush.bf16.msrb.mxu1 %v908_v17  ;;  %936 = vmatpush.msra.mxu2 %v507_v32 }
  0x4d   : > { %523 = vmatpush.msra.mxu0 %v506_v33 }
  0x4e   : > { %937 = vmatpush.msra.mxu2 %v506_v33  ;;  %v685_v33 = vsel %vm683_vm1, %v670_v30, 0  ;;  %v614_v30 = vld [vmem:[%s1357_s19 + $0x10] sm:$0xff] }
  0x4f   : > { %524 = vmatpush.msra.mxu0 %v505_v34  ;;  %694 = vmatpush.bf16.msra.mxu3 %v685_v33 }
  0x50   : > { %443 = vmatpush.bf16.msrb.mxu1 %v900_v21  ;;  %938 = vmatpush.msra.mxu2 %v505_v34  ;;  %v560_v34 = vld [vmem:[%s364_s29 + $0x20] sm:$0xff] }
  0x51   : > { %525 = vmatpush.msra.mxu0 %v504_v35 }
  0x52   : > { %939 = vmatpush.msra.mxu2 %v504_v35  ;;  %v557_v35 = vld [vmem:[%s364_s29 + $0x8] sm:$0xff] }
  0x53   : > { %526 = vmatpush.msra.mxu0 %v503_v36 }
  0x54   : > { %444 = vmatpush.bf16.msrb.mxu1 %v892_v24  ;;  %940 = vmatpush.msra.mxu2 %v503_v36  ;;  %v562_v36 = vld [vmem:[%s364_s29 + $0x30] sm:$0xff] }
  0x55   : > { %527 = vmatpush.msra.mxu0 %v502_v37 }
  0x56   : > { %941 = vmatpush.msra.mxu2 %v502_v37 }
  0x57   : > { %528 = vmatpush.msra.mxu0 %v501_v38 }
  0x58   : > { %445 = vmatpush.bf16.msrb.mxu1 %v884_v27  ;;  %942 = vmatpush.msra.mxu2 %v501_v38  ;;  %v556_v38 = vld [vmem:[%s364_s29] sm:$0xff] }
  0x59   : > { %529 = vmatpush.msra.mxu0 %v500_v39 }
  0x5a   : > { %943 = vmatpush.msra.mxu2 %v500_v39  ;;  %v558_v39 = vld [vmem:[%s364_s29 + $0x10] sm:$0xff] }
  0x5b   : > { %910 = vmatmul.msk.bf16.vlgmr.msrb.gmra.mxu1 %vm421_vm0, %v366_v20  ;;  %530 = vmatpush.msra.mxu0 %v499_v40 }
  0x5c   : > { %944 = vmatpush.msra.mxu2 %v499_v40 }
  0xc8   : > { %v434_v41 = vpop.f32.mrf.mxu1 }
  0xc9   : > { %v1419_v45 = vadd.f32 %v434_v41, %v377_v43  ;;  %v559_v41 = vld [vmem:[%s364_s29 + $0x18] sm:$0xff] }
  0xcb   : > { %v455_v47 = vrot.slane %v1419_v45, 4  ;;  %v459_v49 = vperm.slane %v1419_v45, 0  ;;  %v452_v52 = vrot.slane %v1419_v45, 1  ;;  %v456_v53 = vrot.slane %v1419_v45, 5 }
  0xcc   : > { %v453_v1 = vrot.slane %v1419_v45, 2  ;;  %v457_v2 = vrot.slane %v1419_v45, 6  ;;  %v454_v11 = vrot.slane %v1419_v45, 3  ;;  %v458_v12 = vrot.slane %v1419_v45, 7 }
  0xcd   : > { %v1423_v51 = vperm.slane %v455_v47, 0  ;;  %v1430_v58 = vperm.slane %v452_v52, 0  ;;  %v1432_v59 = vperm.slane %v456_v53, 0 }
  0xce   : > { %v1438_v5 = vperm.slane %v453_v1, 0  ;;  %v1440_v6 = vperm.slane %v457_v2, 0  ;;  %v1446_v15 = vperm.slane %v454_v11, 0  ;;  %v1448_v16 = vperm.slane %v458_v12, 0 }
  0xd0   : > { %v436_v44 = vpop.f32.mrf.mxu1 }
  0xd8   : > { %v447_v48 = vpop.f32.mrf.mxu1 }
  0xd9   : > { %v448_v50 = vadd.f32 %v447_v48, %v378_v46  ;;  %v563_v46 = vld [vmem:[%s364_s29 + $0x38] sm:$0xff]  ;;  %s1142_s29 = scalar_lea.hbm %s1537_s7, 16 }
  0xda   : > { %p1144_p9 = scmp.lt.s32.totalorder %s1142_s29, %s1138_s1 }
  0xdb   : > { %v475_v54 = vadd.f32 %v459_v49, %v448_v50  ;;  %v479_v55 = vadd.f32 %v1423_v51, %v448_v50  ;;  %v476_v62 = vadd.f32 %v1430_v58, %v448_v50  ;;  %v480_v63 = vadd.f32 %v1432_v59, %v448_v50 }
  0xdc   : > { %v477_v9 = vadd.f32 %v1438_v5, %v448_v50  ;;  %v481_v10 = vadd.f32 %v1440_v6, %v448_v50  ;;  %v478_v19 = vadd.f32 %v1446_v15, %v448_v50  ;;  %v482_v20 = vadd.f32 %v1448_v16, %v448_v50  ;;  %p1145_p10 = por %p1144_p9, %p1143_p2 }
  0xdd   : > { %v483_v56 = vmul.f32 0.2, %v475_v54  ;;  %v487_v57 = vmul.f32 0.2, %v479_v55  ;;  %v484_v3 = vmul.f32 0.2, %v476_v62 }
  0xde   : > { %v488_v4 = vmul.f32 0.2, %v480_v63  ;;  %v485_v13 = vmul.f32 0.2, %v477_v9  ;;  %v489_v14 = vmul.f32 0.2, %v481_v10  ;;  %p1146_p12 = pnand %p1145_p10, %p1141_p11 }
  0xdf   : > { %v491_v60 = vmax.f32 %v475_v54, %v483_v56  ;;  %v495_v61 = vmax.f32 %v479_v55, %v487_v57  ;;  %v492_v7 = vmax.f32 %v476_v62, %v484_v3  ;;  %v486_v21 = vmul.f32 0.2, %v478_v19 }
  0xe0   : > { %v449_v0 = vpop.f32.mrf.mxu1  ;;  %v496_v8 = vmax.f32 %v480_v63, %v488_v4  ;;  %v493_v17 = vmax.f32 %v477_v9, %v485_v13  ;;  %v497_v18 = vmax.f32 %v481_v10, %v489_v14  ;;  %v490_v22 = vmul.f32 0.2, %v482_v20 }
  0xe1   : > { %531 = vmatmul.f32.vlgmr.msra.gmra.mxu0 %v491_v60  ;;  %543 = vmatmul.f32.vlgmr.msra.gmra.mxu2 %v495_v61  ;;  %v494_v23 = vmax.f32 %v478_v19, %v486_v21 }
  0xe2   : > { %v498_v24 = vmax.f32 %v482_v20, %v490_v22 }
  0xe9   : > { %534 = vmatmul.f32.gmra.mxu0 %v492_v7  ;;  %546 = vmatmul.f32.gmra.mxu2 %v496_v8 }
  0xf1   : > { %537 = vmatmul.f32.gmra.mxu0 %v493_v17  ;;  %549 = vmatmul.f32.gmra.mxu2 %v497_v18 }
  0xf9   : > { %540 = vmatmul.f32.gmra.mxu0 %v494_v23  ;;  %552 = vmatmul.f32.gmra.mxu2 %v498_v24 }
 0x15e   : > { %v532_v25 = vpop.f32.mrf.mxu0 }
 0x15f   : > { %v564_v47 = vadd.f32 %v556_v38, %v532_v25 }
 0x161   : > { %v573_v61 = vsel %vm572_vm2, %v564_v47, -inf }
 0x164   : > { %v544_v26 = vpop.f32.mrf.mxu2 }
 0x165   : > { %v568_v42 = vadd.f32 %v560_v34, %v544_v26  ;;  %v612_v26 = vld [vmem:[%s1357_s19] sm:$0xff] }
 0x166   : > { %v535_v27 = vpop.f32.mrf.mxu0 }
 0x167   : > { %v565_v43 = vadd.f32 %v557_v35, %v535_v27  ;;  %v577_v54 = vsel %vm572_vm2, %v568_v42, -inf }
 0x168   : > { %v578_v1 = vmax.f32 %v573_v61, %v577_v54 }
 0x169   : > { %v574_v55 = vsel %vm572_vm2, %v565_v43, -inf }
 0x16c   : > { %v547_v28 = vpop.f32.mrf.mxu2 }
 0x16d   : > { %v569_v37 = vadd.f32 %v561_v31, %v547_v28  ;;  %v613_v28 = vld [vmem:[%s1357_s19 + $0x8] sm:$0xff] }
 0x16e   : > { %v538_v29 = vpop.f32.mrf.mxu0 }
 0x16f   : > { %v579_v48 = vsel %vm572_vm2, %v569_v37, -inf  ;;  %v566_v50 = vadd.f32 %v558_v39, %v538_v29 }
 0x170   : > { %v580_v60 = vmax.f32 %v574_v55, %v579_v48 }
 0x171   : > { %v575_v62 = vsel %vm572_vm2, %v566_v50, -inf }
 0x172   : > { %v585_v4 = vmax.f32 %v578_v1, %v580_v60 }
 0x174   : > { %v550_v32 = vpop.f32.mrf.mxu2 }
 0x175   : > { %v570_v44 = vadd.f32 %v562_v36, %v550_v32  ;;  %v615_v32 = vld [vmem:[%s1357_s19 + $0x18] sm:$0xff] }
 0x176   : > { %v541_v40 = vpop.f32.mrf.mxu0 }
 0x177   : > { %v567_v52 = vadd.f32 %v559_v41, %v541_v40  ;;  %v581_v56 = vsel %vm572_vm2, %v570_v44, -inf }
 0x178   : > { %v582_v2 = vmax.f32 %v575_v62, %v581_v56 }
 0x179   : > { %v576_v63 = vsel %vm572_vm2, %v567_v52, -inf }
 0x17c   : > { %v553_v53 = vpop.f32.mrf.mxu2 }
 0x17d   : > { %v571_v57 = vadd.f32 %v563_v46, %v553_v53 }
 0x17f   : > { %v583_v0 = vsel %vm572_vm2, %v571_v57, -inf }
 0x180   : > { %v584_v3 = vmax.f32 %v576_v63, %v583_v0 }
 0x182   : > { %v586_v7 = vmax.f32 %v582_v2, %v584_v3 }
 0x184   : > { %v587_v8 = vmax.f32 %v585_v4, %v586_v7 }
 0x186   : > { %v588_v9 = vsub.f32 %v564_v47, %v587_v8  ;;  %v589_v10 = vsub.f32 %v565_v43, %v587_v8  ;;  %v590_v11 = vsub.f32 %v566_v50, %v587_v8  ;;  %v591_v12 = vsub.f32 %v567_v52, %v587_v8  ;;  %v618_v52 = vld [vmem:[%s1357_s19 + $0x30] sm:$0xff] }
 0x187   : > { %v592_v13 = vsub.f32 %v568_v42, %v587_v8  ;;  %v593_v14 = vsub.f32 %v569_v37, %v587_v8  ;;  %v594_v20 = vsub.f32 %v570_v44, %v587_v8  ;;  %v595_v23 = vsub.f32 %v571_v57, %v587_v8  ;;  %v616_v37 = vld [vmem:[%s1357_s19 + $0x20] sm:$0xff]  ;;  %v617_v44 = vld [vmem:[%s1357_s19 + $0x28] sm:$0xff]  ;;  %v619_v57 = vld [vmem:[%s1357_s19 + $0x38] sm:$0xff]  ;;  %s873_s19 = sshll.u32 %s1354_s2, 3 }
 0x188   : > { %v596_v17 = vmul.f32 1.442695, %v588_v9  ;;  %v598_v18 = vmul.f32 1.442695, %v589_v10  ;;  %v600_v19 = vmul.f32 1.442695, %v590_v11 }
 0x189   : > { %v602_v21 = vmul.f32 1.442695, %v591_v12  ;;  %v604_v22 = vmul.f32 1.442695, %v592_v13  ;;  %v606_v24 = vmul.f32 1.442695, %v593_v14 }
 0x18a   : > { %1014 = vpow2.f32 %v596_v17  ;;  %v608_v25 = vmul.f32 1.442695, %v594_v20  ;;  %v610_v27 = vmul.f32 1.442695, %v595_v23  ;;  %s355_s16 = scalar_lea.vmem [#allocation8], %s873_s19 }
 0x18b   : > { %1016 = vpow2.f32 %v598_v18  ;;  %s745_s17 = sshll.u32 %s355_s16, 4  ;;  %s746_s17 = int_to_ptr.vmem [resolvable:$true] %s745_s17 }
 0x18c   : > { %1018 = vpow2.f32 %v600_v19 }
 0x18d   : > { %1020 = vpow2.f32 %v602_v21 }
 0x18e   : > { %1022 = vpow2.f32 %v604_v22 }
 0x18f   : > { %1024 = vpow2.f32 %v606_v24 }
 0x190   : > { %v1015_v29 = vpop.eup %1014  ;;  %1026 = vpow2.f32 %v608_v25 }
 0x191   : > { %v1017_v31 = vpop.eup %1016  ;;  %v620_v33 = vmul.f32 %v1015_v29, %v612_v26  ;;  %1028 = vpow2.f32 %v610_v27 }
 0x192   : > { %v1019_v34 = vpop.eup %1018  ;;  %v621_v35 = vmul.f32 %v1017_v31, %v613_v28 }
 0x193   : > { %v1021_v36 = vpop.eup %1020  ;;  %v622_v38 = vmul.f32 %v1019_v34, %v614_v30  ;;  %v628_v39 = vsel %vm572_vm2, %v620_v33, 0.0 }
 0x194   : > { %v1023_v40 = vpop.eup %1022  ;;  %v623_v41 = vmul.f32 %v1021_v36, %v615_v32  ;;  %v629_v42 = vsel %vm572_vm2, %v621_v35, 0.0 }
 0x195   : > { %v1025_v43 = vpop.eup %1024  ;;  %v630_v46 = vadd.f32 %v629_v42, %v628_v39  ;;  %v624_v47 = vmul.f32 %v1023_v40, %v616_v37  ;;  %v631_v48 = vsel %vm572_vm2, %v622_v38, 0.0 }
 0x196   : > { %v1027_v50 = vpop.eup %1026  ;;  %v625_v54 = vmul.f32 %v1025_v43, %v617_v44  ;;  %v633_v55 = vsel %vm572_vm2, %v623_v41, 0.0 }
 0x197   : > { %v632_v53 = vadd.f32 %v631_v48, %v630_v46  ;;  %v1029_v56 = vpop.eup %1028  ;;  %v626_v61 = vmul.f32 %v1027_v50, %v618_v52  ;;  %v635_v62 = vsel %vm572_vm2, %v624_v47, 0.0 }
 0x198   : > { %v627_v0 = vmul.f32 %v1029_v56, %v619_v57  ;;  %v637_v1 = vsel %vm572_vm2, %v625_v54, 0.0 }
 0x199   : > { %v634_v60 = vadd.f32 %v633_v55, %v632_v53  ;;  %v639_v3 = vsel %vm572_vm2, %v626_v61, 0.0 }
 0x19a   : > { %v641_v7 = vsel %vm572_vm2, %v627_v0, 0.0 }
 0x19b   : > { %v636_v63 = vadd.f32 %v635_v62, %v634_v60 }
 0x19d   : > { %v638_v2 = vadd.f32 %v637_v1, %v636_v63 }
 0x19f   : > { %v640_v4 = vadd.f32 %v639_v3, %v638_v2 }
 0x1a1   : > { %v642_v8 = vadd.f32 %v641_v7, %v640_v4 }
 0x1a3   : > { %v643_v9 = vmax.f32 %v642_v8, 1e-30 }
 0x1a5   : > { %1030 = vrcp.f32 %v643_v9  ;;  %v655_v13 = vand.u32 2147483648, %v643_v9  ;;  %v653_v17 = vand.u32 2147483647, %v643_v9  ;;  %vm649_vm4 = vweird.f32 %v643_v9 }
 0x1a7   : > { %v656_v19 = vor.u32 1.1754944e-38, %v655_v13  ;;  %vm654_vm6 = vcmp.eq.f32.partialorder %v653_v17, 8.507059e+37 }
 0x1ab   : > { %v1031_v10 = vpop.eup %1030 }
 0x1ac   : > { %v645_v11 = vmul.f32 %v1031_v10, %v643_v9  ;;  %vm650_vm3 = vweird.f32 %v1031_v10 }
 0x1ad   : > { %vm651_vm5 = vmor %vm649_vm4, %vm650_vm3 }
 0x1ae   : > { %v646_v12 = vsub.f32 1.0, %v645_v11 }
 0x1b0   : > { %v647_v14 = vmul.f32 %v1031_v10, %v646_v12 }
 0x1b2   : > { %v648_v18 = vadd.f32 %v1031_v10, %v647_v14 }
 0x1b4   : > { %v652_v20 = vsel %vm651_vm5, %v1031_v10, %v648_v18 }
 0x1b5   : > { %v657_v21 = vsel %vm654_vm6, %v656_v19, %v652_v20 }
 0x1b6   : > { %v658_v22 = vmul.f32 %v657_v21, %v620_v33  ;;  %v659_v23 = vmul.f32 %v657_v21, %v621_v35  ;;  %v664_v24 = vmul.f32 %v657_v21, %v626_v61  ;;  %v665_v25 = vmul.f32 %v657_v21, %v627_v0 }
 0x1b7   : > { %v660_v28 = vmul.f32 %v657_v21, %v622_v38  ;;  %v661_v29 = vmul.f32 %v657_v21, %v623_v41  ;;  %v662_v31 = vmul.f32 %v657_v21, %v624_v47  ;;  %v663_v32 = vmul.f32 %v657_v21, %v625_v54 }
 0x1b8   : > { %v666_v26 = vpack.c.bf16 %v659_v23, %v658_v22  ;;  %v669_v27 = vpack.c.bf16 %v665_v25, %v664_v24 }
 0x1b9   : > { %v667_v30 = vpack.c.bf16 %v661_v29, %v660_v28  ;;  %v668_v34 = vpack.c.bf16 %v663_v32, %v662_v31 }
 0x1ba   : > { %911 = vmatmul.msk.bf16.vlgmr.msra.gmra.mxu3 %vm572_vm2, %v666_v26 }
 0x1ca   : > { %912 = vmatmul.msk.bf16.gmra.mxu3 %vm572_vm2, %v667_v30 }
 0x1da   : > { %913 = vmatmul.msk.bf16.gmra.mxu3 %vm572_vm2, %v668_v34 }
 0x1ea   : > { %914 = vmatmul.msk.bf16.gmra.mxu3 %vm572_vm2, %v669_v27 }
 0x23d   : > { %v696_v33 = vpop.f32.mrf.mxu3 }
 0x23e   : > { %v716_v41 = vmul.f32 %v696_v33, %v459_v49 }
 0x245   : > { %v698_v35 = vpop.f32.mrf.mxu3 }
 0x246   : > { %v717_v38 = vmul.f32 %v698_v35, %v1430_v58 }
 0x248   : > { %v724_v43 = vadd.f32 %v717_v38, %v716_v41 }
 0x24d   : > { %v701_v36 = vpop.f32.mrf.mxu3 }
 0x24e   : > { %v718_v42 = vmul.f32 %v701_v36, %v1438_v5 }
 0x250   : > { %v725_v47 = vadd.f32 %v724_v43, %v718_v42 }
 0x255   : > { %v703_v37 = vpop.f32.mrf.mxu3 }
 0x256   : > { %v719_v44 = vmul.f32 %v703_v37, %v1446_v15 }
 0x258   : > { %v726_v50 = vadd.f32 %v725_v47, %v719_v44 }
 0x25d   : > { %v706_v39 = vpop.f32.mrf.mxu3 }
 0x25e   : > { %v720_v48 = vmul.f32 %v706_v39, %v1423_v51 }
 0x260   : > { %v727_v53 = vadd.f32 %v726_v50, %v720_v48 }
 0x265   : > { %v708_v40 = vpop.f32.mrf.mxu3 }
 0x266   : > { %v721_v52 = vmul.f32 %v708_v40, %v1432_v59 }
 0x268   : > { %v728_v45 = vadd.f32 %v727_v53, %v721_v52 }
 0x26d   : > { %v711_v46 = vpop.f32.mrf.mxu3 }
 0x26e   : > { %v722_v58 = vmul.f32 %v711_v46, %v1440_v6 }
 0x270   : > { %v729_v51 = vadd.f32 %v728_v45, %v722_v58 }
 0x275   : > { %v713_v49 = vpop.f32.mrf.mxu3 }
 0x276   : > { %v723_v5 = vmul.f32 %v713_v49, %v1448_v16 }
 0x278   : > { %v730_v15 = vadd.f32 %v729_v51, %v723_v5 }
 0x27a   : > { %731 = vst [vmem:[%s355_s16] sm:$0xff] %v730_v15 }
 0x27b   : > { %1149 = shalt.err (!%p1146_p12)
}
 0x27c   : > { %955 = dma.vmem_to_hbm [thread:$0]  (%p1311_p3), %s746_s17, 128, %s748_s11, %s733_s28  }
 0x27d PF: > { %s759_s2 = sand.u32 1, %s1184_s24   ;;  %p1551_p13 = scmp.ge.s32.totalorder %s1196_s27, 2 }
 0x27e   : > { %s760_s19 = scalar_lea.sflag [#allocation4], %s759_s2 }
 0x27f   : > { %p969_p0 = pnand %p1551_p13, %p1277_p6 }
 0x281   : > { %p970_p5 = pneg %p969_p0 }
 0x283   : > { %1179 = dma.done.wait (%p970_p5), %s760_s19, 128  }
 0x284   : > { %1181 = vsyncadd (%p970_p5), %s760_s19, 4294967168  ;;  %p19_p7 = scmp.ge.s32.totalorder %s1301_s22, 4   ;;  %s1552_s24 = smov %s1188_s25 }
 0x285   : > { %s1553_s25 = smov %s1192_s26  ;;  %s1554_s26 = smov %s1316_s10 }
 0x286   : > { %s1555_s27 = smov %s1301_s22  ;;  %21 = sbr.rel (!%p19_p7) target bundleno = 8 (0x8), region = 106 }
 0x28b   :  { %766 = vsyncpa [#allocation3], 1 }
 0x28c   :  { %768 = vsyncpa [#allocation3 + $0x1], 1 }
 0x28d   :  { %769 = vsyncpa [#allocation6], 1 }
 0x28e   :  { %770 = vsyncpa [#allocation4], 1 }
 0x28f   :  { %772 = vsyncpa [#allocation4 + $0x1], 1 }

</bundles_post_ra>
